<compile_context>
chip_gen: v5e
topology: v5e:2x2
jax: 0.10.0
libtpu: 0.0.40
codegen_flags: <defaults>
</compile_context>

<pallas_src>
import functools

import jax
import jax.numpy as jnp
from jax import lax
from jax.experimental import pallas as pl
from jax.experimental.pallas import tpu as pltpu


def _round_up(x, m):
    return (x + m - 1) // m * m


def _pick_chunk(T):
    # Tokens per grid step: large chunks amortize the ~0.35us/step overhead and give
    # large contiguous DMAs; the causal intra-chunk math is done in bounded sub-chunks.
    for c in (128, 64, 32, 16, 8):
        if T % c == 0:
            return c
    return T


def _pick_subchunk(Tc):
    # Sub-chunk length for the strictly-causal intra-chunk math: keeps exp(-cumdecay)
    # well inside f32 range even for fast-decay channels.  Multiples of 16 keep bf16
    # sub-slab stores sublane-aligned.
    for s in (32, 16):
        if Tc % s == 0:
            return s
    return Tc


def _pick_group(BH):
    # Heads per grid step.  Prefer keeping >= 2 head-groups so the "parallel" axis can
    # still be split across 2 TensorCores (v7x); VMEM footprint at G=64, Tc=128, N=64
    # with bf16 streams is ~16 MiB, under the 32 MiB scoped default on v6e/v7x.
    for g in (64, 32, 16, 8, 4, 2):
        if BH % g == 0 and BH // g >= 2:
            return g
    for g in (64, 32, 16, 8, 4, 2):
        if BH % g == 0:
            return g
    return 1


# ----------------------------------------------------------------------------
# Pallas kernels
# ----------------------------------------------------------------------------
def wkv6_kernel(r_ref, k_ref, v_ref, w_ref, u_ref, s0_ref, y_ref, s_ref, *, sub_chunk):
    """Chunked RWKV-6 recurrence.

    Block shapes (G = heads/grid step, Tc = tokens/chunk, N = head size):
      r/k/v/w : (G, Tc, N) bf16   raw w is the log-log decay; decay d = exp(-exp(w))
      u       : (G, 1, N)  f32    time_faaaa
      s0      : (G, N, N)  f32    initial state  S[key, value]
      y       : (G, Tc, N)        chunk output
      s       : (G, N, N)  f32    running/final state (resident across the chunk axis)

    Per token:   y_t = r_t . (u * k_t v_t^T + S),    S <- d_t * S + k_t v_t^T
    Within each sub-chunk of Sc tokens, with cumulative decay A_t = prod_{p<t} d_p:
      y_t  = (r_t*A_t) @ S0
           + sum_{s<t} ((r_t*A_t) . (k_s/A_{s+1})) v_s          (strictly causal)
           + (r_t . (u*k_t)) v_t                                 (current-token bonus)
      S_new[i,j] = A_Sc[i] * (S0[i,j] + sum_s (k_s[i]/A_{s+1}[i]) v_s[j])
    Sub-chunking (Sc <= 32) keeps exp(-cum decay) bounded in f32.
    """
    chunk = pl.program_id(1)

    @pl.when(chunk == 0)
    def _():
        s_ref[...] = s0_ref[...]

    G, Tc, _ = r_ref.shape
    Sc = sub_chunk
    u = u_ref[...].astype(jnp.float32)                       # (G, 1, N)

    row = lax.broadcasted_iota(jnp.int32, (Sc, Sc), 0)       # t (output token)
    col = lax.broadcasted_iota(jnp.int32, (Sc, Sc), 1)       # s (source token)
    tri = jnp.broadcast_to((col <= row).astype(jnp.float32)[None], (G, Sc, Sc))
    strict = jnp.broadcast_to((col < row).astype(jnp.float32)[None], (G, Sc, Sc))

    s = s_ref[...]                                           # (G, N, N) running state

    for j in range(Tc // Sc):
        sl = slice(j * Sc, (j + 1) * Sc)
        r = r_ref[:, sl, :].astype(jnp.float32)
        k = k_ref[:, sl, :].astype(jnp.float32)
        v = v_ref[:, sl, :].astype(jnp.float32)
        w = w_ref[:, sl, :].astype(jnp.float32)
        logd = -jnp.exp(w)                                   # log decay (<= 0), EUP

        # Inclusive cumulative log-decay via a lower-triangular batched matmul (MXU,
        # no cumsum, no in-kernel transposes).
        g_incl = jnp.einsum('gts,gsn->gtn', tri, logd,
                            preferred_element_type=jnp.float32)   # log A_{t+1}
        g_excl = g_incl - logd                                     # log A_t

        r_s = r * jnp.exp(g_excl)            # decay-scaled query (factor <= 1)
        k_s = k * jnp.exp(-g_incl)           # inverse-decay-scaled key (bounded by Sc)

        # Inter-(sub)chunk contribution from the carried state: (G,Sc,N)@(G,N,N).
        y_inter = jnp.einsum('gtn,gnm->gtm', r_s, s,
                             preferred_element_type=jnp.float32)

        # Intra-sub-chunk strictly-causal contribution + current-token (u) bonus.
        scores = jnp.einsum('gtn,gsn->gts', r_s, k_s,
                            preferred_element_type=jnp.float32)    # (G, Sc, Sc)
        scores = scores * strict
        y_intra = jnp.einsum('gts,gsn->gtn', scores, v,
                             preferred_element_type=jnp.float32)
        bonus = jnp.sum(r * u * k, axis=-1, keepdims=True)         # (G, Sc, 1)
        y_ref[:, sl, :] = (y_inter + y_intra + bonus * v).astype(y_ref.dtype)

        # State update: S <- diag(A_Sc) (S + K_s^T V).  A_Sc reused from g_incl's
        # last row (no extra reduction over the time axis).
        kv = jnp.einsum('gsn,gsm->gnm', k_s, v,
                        preferred_element_type=jnp.float32)        # (G, N, N)
        a_end = jnp.exp(g_incl[:, -1, :])[:, :, None]              # (G, N, 1) = A_Sc
        s = a_end * (s + kv)

    s_ref[...] = s


def wkv6_pallas(r, k, v, w, u, s0, out_dtype=jnp.float32):
    """r,k,v,w: (BH, T, N); u: (BH, 1, N); s0: (BH, N, N) -> y (BH,T,N), s (BH,N,N).

    r/k/v/w are streamed through HBM as bf16 (the recurrence is HBM-bandwidth bound);
    all decay / state / accumulation math stays f32 inside the kernel.
    """
    BH, T, N = r.shape
    Tc = _pick_chunk(T)
    Sc = _pick_subchunk(Tc)
    G = _pick_group(BH)

    rb, kb, vb, wb = (a.astype(jnp.bfloat16) for a in (r, k, v, w))
    u32 = u.astype(jnp.float32)
    s32 = s0.astype(jnp.float32)

    tn_spec = pl.BlockSpec((G, Tc, N), lambda g, c: (g, c, 0))

    def hd_spec(shape):
        return pl.BlockSpec(shape, lambda g, c: (g, 0, 0))

    y, s_out = pl.pallas_call(
        functools.partial(wkv6_kernel, sub_chunk=Sc),
        grid=(BH // G, T // Tc),
        in_specs=[tn_spec, tn_spec, tn_spec, tn_spec,
                  hd_spec((G, 1, N)), hd_spec((G, N, N))],
        out_specs=(tn_spec, hd_spec((G, N, N))),
        out_shape=(jax.ShapeDtypeStruct((BH, T, N), out_dtype),
                   jax.ShapeDtypeStruct((BH, N, N), jnp.float32)),
        compiler_params=pltpu.CompilerParams(
            dimension_semantics=("parallel", "arbitrary")),
        # TODO(synk): try pltpu.CORE_PARALLEL on the head-group axis for v7x's 2 TCs.
    )(rb, kb, vb, wb, u32, s32)
    return y, s_out


def matmul_kernel(x_ref, w_ref, o_ref):
    # Accumulate directly into the resident f32 output block (no extra VMEM scratch).
    @pl.when(pl.program_id(2) == 0)
    def _():
        o_ref[...] = jnp.zeros_like(o_ref)

    o_ref[...] += jnp.dot(x_ref[...], w_ref[...],
                          preferred_element_type=jnp.float32)


_HEAD_TM, _HEAD_TN, _HEAD_TK = 512, 512, 512


def _head_tiles(C, V):
    tk = min(_HEAD_TK, _round_up(C, 128))
    tn = min(_HEAD_TN, _round_up(V, 128))
    return tk, tn


def prepare_head_weight(head_w):
    """(V, C) head weight -> pre-transposed, pre-padded bf16 (Cp, Vp).  Done once at
    init so the forward path never re-materializes a padded / casted weight copy."""
    V, C = head_w.shape
    tk, tn = _head_tiles(C, V)
    Cp, Vp = _round_up(C, tk), _round_up(V, tn)
    w_t = head_w.T
    if (Cp, Vp) != (C, V):
        w_t = jnp.pad(w_t, ((0, Cp - C), (0, Vp - V)))
    return w_t.astype(jnp.bfloat16)


def head_matmul_pallas(x2d, w_prepared, V):
    """Tiled (M, C) @ (C, V) -> (M, V) logits.  bf16 MXU operands, f32 accumulation
    directly in the resident output block.  Tiles (512x512) stay well under the
    32 MiB scoped VMEM default on v6e/v7x with double buffering."""
    M, C = x2d.shape
    tk, tn = _head_tiles(C, V)
    tm = min(_HEAD_TM, _round_up(M, 8))
    Mp, Cp, Vp = _round_up(M, tm), _round_up(C, tk), _round_up(V, tn)
    assert w_prepared.shape == (Cp, Vp), (w_prepared.shape, (Cp, Vp))

    x_p = jnp.pad(x2d, ((0, Mp - M), (0, Cp - C))) if (Mp, Cp) != (M, C) else x2d
    xb = x_p.astype(jnp.bfloat16)

    out = pl.pallas_call(
        matmul_kernel,
        out_shape=jax.ShapeDtypeStruct((Mp, Vp), jnp.float32),
        grid_spec=pltpu.PrefetchScalarGridSpec(
            num_scalar_prefetch=0,
            grid=(Mp // tm, Vp // tn, Cp // tk),
            in_specs=[pl.BlockSpec((tm, tk), lambda i, j, kk: (i, kk)),
                      pl.BlockSpec((tk, tn), lambda i, j, kk: (kk, j))],
            out_specs=pl.BlockSpec((tm, tn), lambda i, j, kk: (i, j))),
        compiler_params=pltpu.CompilerParams(
            dimension_semantics=("parallel", "parallel", "arbitrary")),
        cost_estimate=pl.CostEstimate(
            flops=2 * Mp * Vp * Cp, transcendentals=0,
            bytes_accessed=xb.size * 2 + w_prepared.size * 2 + Mp * Vp * 4),
    )(xb, w_prepared)
    return out[:M, :V]


# ----------------------------------------------------------------------------
# Pure-JAX per-token reference (used only to validate the chunked kernel)
# ----------------------------------------------------------------------------
def wkv6_reference(r, k, v, w, u, s0):
    d = jnp.exp(-jnp.exp(w))                                   # (BH, T, N)
    u2 = u[:, 0, :, None]                                      # (BH, N, 1)

    def step(s, inp):
        r_t, k_t, v_t, d_t = inp                               # (BH, N) each
        kv = k_t[:, :, None] * v_t[:, None, :]                 # (BH, N, N)
        y_t = jnp.einsum('bn,bnm->bm', r_t, u2 * kv + s)
        return d_t[:, :, None] * s + kv, y_t

    xs = tuple(a.transpose(1, 0, 2) for a in (r, k, v, d))
    s_fin, ys = lax.scan(step, s0, xs)
    return ys.transpose(1, 0, 2), s_fin


# ----------------------------------------------------------------------------
# Plain-JAX glue (norms, token shift, linear projections, gating)
# ----------------------------------------------------------------------------
def layer_norm(x, w, b, eps=1e-5):
    mu = x.mean(axis=-1, keepdims=True)
    var = ((x - mu) ** 2).mean(axis=-1, keepdims=True)
    return (x - mu) / jnp.sqrt(var + eps) * w + b


def group_norm(x2d, w, b, num_groups, eps):
    M, C = x2d.shape
    g = C // num_groups
    xg = x2d.reshape(M, num_groups, g)
    mu = xg.mean(axis=-1, keepdims=True)
    var = ((xg - mu) ** 2).mean(axis=-1, keepdims=True)
    xg = (xg - mu) / jnp.sqrt(var + eps)
    return xg.reshape(M, C) * w + b


def time_mix(x, shift_state, wkv_state, p, n_head, head_size):
    """RWKV_Tmix_x060 with explicit state. x: (B,T,C)."""
    B, T, C = x.shape
    H, N = n_head, head_size

    xprev = jnp.concatenate([shift_state[:, None, :], x[:, :-1, :]], axis=1)
    dx = xprev - x

    xxx = x + dx * p['time_maa_x']
    xxx = jnp.tanh(xxx.reshape(B * T, C) @ p['time_maa_w1'])
    D = p['time_maa_w2'].shape[1]
    xxx = xxx.reshape(B * T, 5, D).transpose(1, 0, 2)          # (5, B*T, D)
    xxx = jnp.einsum('sbd,sdc->sbc', xxx, p['time_maa_w2'])    # (5, B*T, C)
    xxx = xxx.reshape(5, B, T, C)
    mw, mk, mv, mr, mg = xxx[0], xxx[1], xxx[2], xxx[3], xxx[4]

    xw = x + dx * (p['time_maa_w'] + mw)
    xk = x + dx * (p['time_maa_k'] + mk)
    xv = x + dx * (p['time_maa_v'] + mv)
    xr = x + dx * (p['time_maa_r'] + mr)
    xg = x + dx * (p['time_maa_g'] + mg)

    r = xr @ p['receptance'].T
    k = xk @ p['key'].T
    v = xv @ p['value'].T
    g = jax.nn.silu(xg @ p['gate'].T)

    ww = jnp.tanh(xw @ p['time_decay_w1']) @ p['time_decay_w2']
    w = p['time_decay'] + ww                                   # raw log-log decay

    def to_heads(a):
        # bf16 before the relayout: halves the HBM bytes of the transpose pass and
        # matches the kernel's bf16 streaming dtype.
        return (a.astype(jnp.bfloat16).reshape(B, T, H, N)
                .transpose(0, 2, 1, 3).reshape(B * H, T, N))
    # TODO(synk): drop these head-major relayouts entirely by gridding the WKV kernel
    # over (B, H//G, T//Tc) and reading (1, Tc, G*N) slabs straight from the (B,T,C)
    # layout via the BlockSpec index_map.

    r_h, k_h, v_h, w_h = map(to_heads, (r, k, v, w))
    u_h = jnp.broadcast_to(p['time_faaaa'][None, :, None, :],
                           (B, H, 1, N)).reshape(B * H, 1, N)
    s0 = wkv_state.reshape(B * H, N, N)

    y_h, s_new = wkv6_pallas(r_h, k_h, v_h, w_h, u_h, s0, out_dtype=jnp.bfloat16)

    y = y_h.reshape(B, H, T, N).transpose(0, 2, 1, 3).reshape(B, T, C)
    # ln_x: GroupNorm(n_head, C) with eps = 1e-5 * head_size_divisor**2 (divisor=8)
    y = group_norm(y.reshape(B * T, C).astype(jnp.float32),
                   p['ln_x_w'], p['ln_x_b'], H, eps=1e-5 * 64.0).reshape(B, T, C)
    out = (y * g) @ p['output'].T

    new_shift = x[:, -1, :]
    return out, new_shift, s_new.reshape(B, H, N, N)


def channel_mix(x, shift_state, p):
    xprev = jnp.concatenate([shift_state[:, None, :], x[:, :-1, :]], axis=1)
    dx = xprev - x
    xk = x + dx * p['time_maa_k']
    xr = x + dx * p['time_maa_r']
    k = jnp.square(jax.nn.relu(xk @ p['key'].T))
    kv = k @ p['value'].T
    out = jax.nn.sigmoid(xr @ p['receptance'].T) * kv
    return out, x[:, -1, :]


def block_forward(x, state, blk, layer_id, n_head, head_size):
    if layer_id == 0:
        x = layer_norm(x, blk['ln0_w'], blk['ln0_b'])
    att_in = layer_norm(x, blk['ln1_w'], blk['ln1_b'])
    att_out, tshift, wkv = time_mix(att_in, state['tshift'], state['wkv'],
                                    blk['att'], n_head, head_size)
    x = x + att_out
    ffn_in = layer_norm(x, blk['ln2_w'], blk['ln2_b'])
    ffn_out, cshift = channel_mix(ffn_in, state['cshift'], blk['ffn'])
    x = x + ffn_out
    return x, {'tshift': tshift, 'wkv': wkv, 'cshift': cshift}


def rwkv_forward(params, idx, cfg, states=None):
    """Equivalent of RWKV.forward(idx, states=None) -> (logits, new_states)."""
    B, T = idx.shape
    C, H, N, L = cfg['n_embd'], cfg['n_head'], cfg['head_size'], cfg['n_layer']

    x = params['emb'][idx].astype(jnp.float32)     # nn.Embedding lookup
    # TODO(synk): dropout / torch_checkpoint / deepspeed checkpointing / LoRA merge /
    # voice (vocoder) branch have no inference-time effect here and are omitted.

    if states is None:
        states = [{'tshift': jnp.zeros((B, C), jnp.float32),
                   'wkv': jnp.zeros((B, H, N, N), jnp.float32),
                   'cshift': jnp.zeros((B, C), jnp.float32)} for _ in range(L)]

    new_states = []
    for i in range(L):
        x, st = block_forward(x, states[i], params['blocks'][i], i, H, N)
        new_states.append(st)

    x = layer_norm(x, params['ln_out_w'], params['ln_out_b'])
    head_prep = params.get('head_prepared')
    if head_prep is None:
        head_prep = prepare_head_weight(params['head'])
    V = params['head'].shape[0]
    logits = head_matmul_pallas(x.reshape(B * T, C), head_prep, V)
    logits = logits.reshape(B, T, V)
    return logits, new_states


# ----------------------------------------------------------------------------
# Deterministic parameter init (shapes match the PyTorch module)
# ----------------------------------------------------------------------------
def init_params(key, n_layer, n_embd, n_head, head_size, dim_ffn, vocab_size):
    D_MIX, D_DECAY = 32, 64
    keys = iter(jax.random.split(key, 512))

    def nrm(shape, std=0.02):
        return jax.random.normal(next(keys), shape, jnp.float32) * std

    def unif(shape, lo, hi):
        return jax.random.uniform(next(keys), shape, jnp.float32, lo, hi)

    params = {
        'emb': nrm((vocab_size, n_embd)),
        'ln_out_w': jnp.ones((n_embd,), jnp.float32),
        'ln_out_b': jnp.zeros((n_embd,), jnp.float32),
        'head': nrm((vocab_size, n_embd)),
        'blocks': [],
    }
    # Hoisted: padded / transposed / bf16 head weight is prepared once at init.
    params['head_prepared'] = prepare_head_weight(params['head'])

    for layer in range(n_layer):
        blk = {
            'ln1_w': jnp.ones((n_embd,), jnp.float32),
            'ln1_b': jnp.zeros((n_embd,), jnp.float32),
            'ln2_w': jnp.ones((n_embd,), jnp.float32),
            'ln2_b': jnp.zeros((n_embd,), jnp.float32),
            'att': {
                'time_maa_x': unif((n_embd,), 0.0, 1.0),
                'time_maa_w': unif((n_embd,), 0.0, 1.0),
                'time_maa_k': unif((n_embd,), 0.0, 1.0),
                'time_maa_v': unif((n_embd,), 0.0, 1.0),
                'time_maa_r': unif((n_embd,), 0.0, 1.0),
                'time_maa_g': unif((n_embd,), 0.0, 1.0),
                'time_maa_w1': nrm((n_embd, D_MIX * 5), 0.01),
                'time_maa_w2': nrm((5, D_MIX, n_embd), 0.01),
                'time_decay': unif((n_embd,), -6.0, -4.0),
                'time_decay_w1': nrm((n_embd, D_DECAY), 0.01),
                'time_decay_w2': nrm((D_DECAY, n_embd), 0.01),
                'time_faaaa': nrm((n_head, head_size), 0.1),
                'receptance': nrm((n_embd, n_embd)),
                'key': nrm((n_embd, n_embd)),
                'value': nrm((n_embd, n_embd)),
                'gate': nrm((n_embd, n_embd)),
                'output': nrm((n_embd, n_embd)),
                'ln_x_w': jnp.ones((n_embd,), jnp.float32),
                'ln_x_b': jnp.zeros((n_embd,), jnp.float32),
            },
            'ffn': {
                'time_maa_k': unif((n_embd,), 0.0, 1.0),
                'time_maa_r': unif((n_embd,), 0.0, 1.0),
                'key': nrm((dim_ffn, n_embd)),
                'receptance': nrm((n_embd, n_embd)),
                'value': nrm((n_embd, dim_ffn)),
            },
        }
        if layer == 0:
            blk['ln0_w'] = jnp.ones((n_embd,), jnp.float32)
            blk['ln0_b'] = jnp.zeros((n_embd,), jnp.float32)
        params['blocks'].append(blk)
    return params


# ----------------------------------------------------------------------------
if __name__ == "__main__":
    def bf16_round(x):
        # Match the kernel's bf16 HBM streaming so the reference sees identical inputs.
        return x.astype(jnp.bfloat16).astype(jnp.float32)

    def rel_err(a, b):
        return float(jnp.max(jnp.abs(a.astype(jnp.float32) - b)) /
                     (jnp.max(jnp.abs(b)) + 1e-6))

    # --- 1) small-shape sanity check of the chunked WKV kernel ---
    kk = jax.random.split(jax.random.PRNGKey(0), 6)
    BH_t, T_t, N_t = 4, 8, 8
    r_t = jax.random.normal(kk[0], (BH_t, T_t, N_t), jnp.float32)
    k_t = jax.random.normal(kk[1], (BH_t, T_t, N_t), jnp.float32)
    v_t = jax.random.normal(kk[2], (BH_t, T_t, N_t), jnp.float32)
    w_t = jax.random.uniform(kk[3], (BH_t, T_t, N_t), jnp.float32, -6.0, -4.0)
    u_t = 0.1 * jax.random.normal(kk[4], (BH_t, 1, N_t), jnp.float32)
    s_t = 0.5 * jax.random.normal(kk[5], (BH_t, N_t, N_t), jnp.float32)

    y_pl, s_pl = wkv6_pallas(r_t, k_t, v_t, w_t, u_t, s_t)
    y_rf, s_rf = wkv6_reference(bf16_round(r_t), bf16_round(k_t), bf16_round(v_t),
                                bf16_round(w_t), u_t, s_t)
    jax.block_until_ready(y_pl)
    assert rel_err(y_pl, y_rf) < 2e-3, "WKV6 kernel mismatch (y, small)"
    assert rel_err(s_pl, s_rf) < 2e-3, "WKV6 kernel mismatch (state, small)"

    # --- 2) multi-chunk / sub-chunk path at a realistic head size ---
    kk2 = jax.random.split(jax.random.PRNGKey(1), 6)
    BH2, T2, N2 = 8, 256, 64
    r2 = jax.random.normal(kk2[0], (BH2, T2, N2), jnp.float32)
    k2 = jax.random.normal(kk2[1], (BH2, T2, N2), jnp.float32)
    v2 = jax.random.normal(kk2[2], (BH2, T2, N2), jnp.float32)
    w2 = jax.random.uniform(kk2[3], (BH2, T2, N2), jnp.float32, -6.0, -1.0)
    u2 = 0.1 * jax.random.normal(kk2[4], (BH2, 1, N2), jnp.float32)
    s2 = 0.5 * jax.random.normal(kk2[5], (BH2, N2, N2), jnp.float32)

    y2_pl, s2_pl = wkv6_pallas(r2, k2, v2, w2, u2, s2)
    y2_rf, s2_rf = wkv6_reference(bf16_round(r2), bf16_round(k2), bf16_round(v2),
                                  bf16_round(w2), u2, s2)
    jax.block_until_ready(y2_pl)
    assert rel_err(y2_pl, y2_rf) < 2e-3, "WKV6 kernel mismatch (y, chunked)"
    assert rel_err(s2_pl, s2_rf) < 2e-3, "WKV6 kernel mismatch (state, chunked)"

    # --- full model forward at a toy configuration ---
    # n_embd=32, head_size=8 -> n_head=4; dim_ffn = int(32*3.5//32*32) = 96
    cfg = dict(n_layer=2, n_embd=32, head_size=8, n_head=4,
               dim_ffn=96, vocab_size=64)

    key = jax.random.PRNGKey(0)
    pkey, ikey = jax.random.split(key)
    params = init_params(pkey, cfg['n_layer'], cfg['n_embd'], cfg['n_head'],
                         cfg['head_size'], cfg['dim_ffn'], cfg['vocab_size'])

    B, T = 2, 8
    idx = jax.random.randint(ikey, (B, T), 0, cfg['vocab_size'])

    logits, new_states = rwkv_forward(params, idx, cfg)
    jax.block_until_ready(logits)
    assert logits.shape == (B, T, cfg['vocab_size'])
    print("KERNEL_OK")
</pallas_src>

<mosaic_0001>
module attributes {stable_mosaic.version = 11 : i64} {
  func.func @wkv6_kernel(%arg0: i32, %arg1: i32, %arg2: memref<2x8x8xbf16, #tpu.memory_space<vmem>>, %arg3: memref<2x8x8xbf16, #tpu.memory_space<vmem>>, %arg4: memref<2x8x8xbf16, #tpu.memory_space<vmem>>, %arg5: memref<2x8x8xbf16, #tpu.memory_space<vmem>>, %arg6: memref<2x1x8xf32, #tpu.memory_space<vmem>>, %arg7: memref<2x8x8xf32, #tpu.memory_space<vmem>>, %arg8: memref<2x8x8xf32, #tpu.memory_space<vmem>>, %arg9: memref<2x8x8xf32, #tpu.memory_space<vmem>>) attributes {dimension_semantics = [#tpu.dimension_semantics<parallel>, #tpu.dimension_semantics<arbitrary>], iteration_bounds = array<i64: 2, 1>, scalar_prefetch = 0 : i64, scratch_operands = 0 : i64, tpu.core_type = #tpu.core_type<tc>, window_params = [{transform_indices = @transform_0, window_bounds = array<i64: 2, 8, 8>}, {transform_indices = @transform_1, window_bounds = array<i64: 2, 8, 8>}, {transform_indices = @transform_2, window_bounds = array<i64: 2, 8, 8>}, {transform_indices = @transform_3, window_bounds = array<i64: 2, 8, 8>}, {transform_indices = @transform_4, window_bounds = array<i64: 2, 1, 8>}, {transform_indices = @transform_5, window_bounds = array<i64: 2, 8, 8>}, {transform_indices = @transform_6, window_bounds = array<i64: 2, 8, 8>}, {transform_indices = @transform_7, window_bounds = array<i64: 2, 8, 8>}]} {
    %c0_i32 = arith.constant 0 : i32
    %0 = arith.cmpi eq, %arg1, %c0_i32 : i32
    %1 = arith.extui %0 : i1 to i32
    %c0_i32_0 = arith.constant 0 : i32
    %2 = arith.cmpi ne, %1, %c0_i32_0 : i32
    scf.if %2 {
      %c0_31 = arith.constant 0 : index
      %c0_32 = arith.constant 0 : index
      %c0_33 = arith.constant 0 : index
      %61 = vector.load %arg7[%c0_31, %c0_32, %c0_33] : memref<2x8x8xf32, #tpu.memory_space<vmem>>, vector<2x8x8xf32>
      %c0_34 = arith.constant 0 : index
      %c0_35 = arith.constant 0 : index
      %c0_36 = arith.constant 0 : index
      %62 = vector.load %arg9[%c0_34, %c0_35, %c0_36] : memref<2x8x8xf32, #tpu.memory_space<vmem>>, vector<2x8x8xf32>
      tpu.vector_store %arg9[%c0_34, %c0_35, %c0_36], %61 {strides = array<i32>} : memref<2x8x8xf32, #tpu.memory_space<vmem>>, vector<2x8x8xf32>,
    } else {
    }
    %c0 = arith.constant 0 : index
    %c0_1 = arith.constant 0 : index
    %c0_2 = arith.constant 0 : index
    %3 = vector.load %arg6[%c0, %c0_1, %c0_2] : memref<2x1x8xf32, #tpu.memory_space<vmem>>, vector<2x1x8xf32>
    %4 = tpu.iota {dimensions = array<i32: 0>} : vector<8x8xi32>
    %5 = tpu.iota {dimensions = array<i32: 1>} : vector<8x8xi32>
    %6 = arith.cmpi sle, %5, %4 : vector<8x8xi32>
    %7 = arith.extui %6 : vector<8x8xi1> to vector<8x8xi32>
    %8 = arith.sitofp %7 : vector<8x8xi32> to vector<8x8xf32>
    %9 = vector.shape_cast %8 : vector<8x8xf32> to vector<1x8x8xf32>
    %10 = vector.shape_cast %9 : vector<1x8x8xf32> to vector<1x8x8xf32>
    %11 = vector.broadcast %10 : vector<1x8x8xf32> to vector<2x8x8xf32>
    %12 = arith.cmpi slt, %5, %4 : vector<8x8xi32>
    %13 = arith.extui %12 : vector<8x8xi1> to vector<8x8xi32>
    %14 = arith.sitofp %13 : vector<8x8xi32> to vector<8x8xf32>
    %15 = vector.shape_cast %14 : vector<8x8xf32> to vector<1x8x8xf32>
    %16 = vector.shape_cast %15 : vector<1x8x8xf32> to vector<1x8x8xf32>
    %17 = vector.broadcast %16 : vector<1x8x8xf32> to vector<2x8x8xf32>
    %c0_3 = arith.constant 0 : index
    %c0_4 = arith.constant 0 : index
    %c0_5 = arith.constant 0 : index
    %18 = vector.load %arg9[%c0_3, %c0_4, %c0_5] : memref<2x8x8xf32, #tpu.memory_space<vmem>>, vector<2x8x8xf32>
    %c0_6 = arith.constant 0 : index
    %c0_7 = arith.constant 0 : index
    %c0_8 = arith.constant 0 : index
    %19 = vector.load %arg2[%c0_6, %c0_7, %c0_8] : memref<2x8x8xbf16, #tpu.memory_space<vmem>>, vector<2x8x8xbf16>
    %20 = arith.extf %19 : vector<2x8x8xbf16> to vector<2x8x8xf32>
    %c0_9 = arith.constant 0 : index
    %c0_10 = arith.constant 0 : index
    %c0_11 = arith.constant 0 : index
    %21 = vector.load %arg3[%c0_9, %c0_10, %c0_11] : memref<2x8x8xbf16, #tpu.memory_space<vmem>>, vector<2x8x8xbf16>
    %22 = arith.extf %21 : vector<2x8x8xbf16> to vector<2x8x8xf32>
    %c0_12 = arith.constant 0 : index
    %c0_13 = arith.constant 0 : index
    %c0_14 = arith.constant 0 : index
    %23 = vector.load %arg4[%c0_12, %c0_13, %c0_14] : memref<2x8x8xbf16, #tpu.memory_space<vmem>>, vector<2x8x8xbf16>
    %24 = arith.extf %23 : vector<2x8x8xbf16> to vector<2x8x8xf32>
    %c0_15 = arith.constant 0 : index
    %c0_16 = arith.constant 0 : index
    %c0_17 = arith.constant 0 : index
    %25 = vector.load %arg5[%c0_15, %c0_16, %c0_17] : memref<2x8x8xbf16, #tpu.memory_space<vmem>>, vector<2x8x8xbf16>
    %26 = arith.extf %25 : vector<2x8x8xbf16> to vector<2x8x8xf32>
    %27 = math.exp %26 : vector<2x8x8xf32>
    %cst = arith.constant 0.000000e+00 : f32
    %28 = vector.broadcast %cst : f32 to vector<2x8x8xf32>
    %29 = arith.subf %28, %27 : vector<2x8x8xf32>
    "tpu.trace_start"() <{level = 10 : i32, message = "gts,gsn->gtn"}> : () -> ()
    %cst_18 = arith.constant dense<0.000000e+00> : vector<2x8x8xf32>
    %30 = tpu.matmul %11, %29, %cst_18 {dimension_numbers = #tpu.dot_dimension_numbers<[2], [1], [1], [2], [0, 0, 0, 1, 1, 2], [0], [0]>} : vector<2x8x8xf32>, vector<2x8x8xf32>, vector<2x8x8xf32> -> vector<2x8x8xf32>
    "tpu.trace_stop"() : () -> ()
    %31 = arith.subf %30, %29 : vector<2x8x8xf32>
    %32 = math.exp %31 : vector<2x8x8xf32>
    %33 = arith.mulf %20, %32 : vector<2x8x8xf32>
    %cst_19 = arith.constant 0.000000e+00 : f32
    %34 = vector.broadcast %cst_19 : f32 to vector<2x8x8xf32>
    %35 = arith.subf %34, %30 : vector<2x8x8xf32>
    %36 = math.exp %35 : vector<2x8x8xf32>
    %37 = arith.mulf %22, %36 : vector<2x8x8xf32>
    "tpu.trace_start"() <{level = 10 : i32, message = "gtn,gnm->gtm"}> : () -> ()
    %cst_20 = arith.constant dense<0.000000e+00> : vector<2x8x8xf32>
    %38 = tpu.matmul %33, %18, %cst_20 {dimension_numbers = #tpu.dot_dimension_numbers<[2], [1], [1], [2], [0, 0, 0, 1, 1, 2], [0], [0]>} : vector<2x8x8xf32>, vector<2x8x8xf32>, vector<2x8x8xf32> -> vector<2x8x8xf32>
    "tpu.trace_stop"() : () -> ()
    "tpu.trace_start"() <{level = 10 : i32, message = "gtn,gsn->gts"}> : () -> ()
    %cst_21 = arith.constant dense<0.000000e+00> : vector<2x8x8xf32>
    %39 = tpu.matmul %33, %37, %cst_21 {dimension_numbers = #tpu.dot_dimension_numbers<[2], [2], [1], [1], [0, 0, 0, 1, 1, 1], [0], [0]>} : vector<2x8x8xf32>, vector<2x8x8xf32>, vector<2x8x8xf32> -> vector<2x8x8xf32>
    "tpu.trace_stop"() : () -> ()
    %40 = arith.mulf %39, %17 : vector<2x8x8xf32>
    "tpu.trace_start"() <{level = 10 : i32, message = "gts,gsn->gtn"}> : () -> ()
    %cst_22 = arith.constant dense<0.000000e+00> : vector<2x8x8xf32>
    %41 = tpu.matmul %40, %24, %cst_22 {dimension_numbers = #tpu.dot_dimension_numbers<[2], [1], [1], [2], [0, 0, 0, 1, 1, 2], [0], [0]>} : vector<2x8x8xf32>, vector<2x8x8xf32>, vector<2x8x8xf32> -> vector<2x8x8xf32>
    "tpu.trace_stop"() : () -> ()
    %42 = vector.broadcast %3 : vector<2x1x8xf32> to vector<2x8x8xf32>
    %43 = arith.mulf %20, %42 : vector<2x8x8xf32>
    %44 = arith.mulf %43, %22 : vector<2x8x8xf32>
    %cst_23 = arith.constant dense<0.000000e+00> : vector<2x8xf32>
    %45 = vector.multi_reduction <add>, %44, %cst_23 [2] : vector<2x8x8xf32> to vector<2x8xf32>
    %46 = vector.shape_cast %45 : vector<2x8xf32> to vector<2x8x1xf32>
    %47 = arith.addf %38, %41 : vector<2x8x8xf32>
    %48 = vector.broadcast %46 : vector<2x8x1xf32> to vector<2x8x8xf32>
    %49 = arith.mulf %48, %24 : vector<2x8x8xf32>
    %50 = arith.addf %47, %49 : vector<2x8x8xf32>
    %c0_24 = arith.constant 0 : index
    %c0_25 = arith.constant 0 : index
    %c0_26 = arith.constant 0 : index
    %51 = vector.load %arg8[%c0_24, %c0_25, %c0_26] : memref<2x8x8xf32, #tpu.memory_space<vmem>>, vector<2x8x8xf32>
    tpu.vector_store %arg8[%c0_24, %c0_25, %c0_26], %50 {strides = array<i32>} : memref<2x8x8xf32, #tpu.memory_space<vmem>>, vector<2x8x8xf32>,
    "tpu.trace_start"() <{level = 10 : i32, message = "gsn,gsm->gnm"}> : () -> ()
    %cst_27 = arith.constant dense<0.000000e+00> : vector<2x8x8xf32>
    %52 = tpu.matmul %37, %24, %cst_27 {dimension_numbers = #tpu.dot_dimension_numbers<[1], [1], [2], [2], [0, 0, 0, 2, 1, 2], [0], [0]>} : vector<2x8x8xf32>, vector<2x8x8xf32>, vector<2x8x8xf32> -> vector<2x8x8xf32>
    "tpu.trace_stop"() : () -> ()
    %53 = vector.extract_strided_slice %30 {offsets = [0, 7, 0], sizes = [2, 1, 8], strides = [1, 1, 1]} : vector<2x8x8xf32> to vector<2x1x8xf32>
    %54 = vector.shape_cast %53 : vector<2x1x8xf32> to vector<2x8xf32>
    %55 = math.exp %54 : vector<2x8xf32>
    %56 = vector.shape_cast %55 : vector<2x8xf32> to vector<2x8x1xf32>
    %57 = arith.addf %18, %52 : vector<2x8x8xf32>
    %58 = vector.broadcast %56 : vector<2x8x1xf32> to vector<2x8x8xf32>
    %59 = arith.mulf %58, %57 : vector<2x8x8xf32>
    %c0_28 = arith.constant 0 : index
    %c0_29 = arith.constant 0 : index
    %c0_30 = arith.constant 0 : index
    %60 = vector.load %arg9[%c0_28, %c0_29, %c0_30] : memref<2x8x8xf32, #tpu.memory_space<vmem>>, vector<2x8x8xf32>
    tpu.vector_store %arg9[%c0_28, %c0_29, %c0_30], %59 {strides = array<i32>} : memref<2x8x8xf32, #tpu.memory_space<vmem>>, vector<2x8x8xf32>,
    return
  }
  func.func @transform_0(%arg0: i32, %arg1: i32) -> (i32, i32, i32) {
    %c0_i32 = arith.constant 0 : i32
    %c0_i32_0 = arith.constant 0 : i32
    return %arg0, %arg1, %c0_i32 : i32, i32, i32
  }
  func.func @transform_1(%arg0: i32, %arg1: i32) -> (i32, i32, i32) {
    %c0_i32 = arith.constant 0 : i32
    %c0_i32_0 = arith.constant 0 : i32
    return %arg0, %arg1, %c0_i32 : i32, i32, i32
  }
  func.func @transform_2(%arg0: i32, %arg1: i32) -> (i32, i32, i32) {
    %c0_i32 = arith.constant 0 : i32
    %c0_i32_0 = arith.constant 0 : i32
    return %arg0, %arg1, %c0_i32 : i32, i32, i32
  }
  func.func @transform_3(%arg0: i32, %arg1: i32) -> (i32, i32, i32) {
    %c0_i32 = arith.constant 0 : i32
    %c0_i32_0 = arith.constant 0 : i32
    return %arg0, %arg1, %c0_i32 : i32, i32, i32
  }
  func.func @transform_4(%arg0: i32, %arg1: i32) -> (i32, i32, i32) {
    %c0_i32 = arith.constant 0 : i32
    %c0_i32_0 = arith.constant 0 : i32
    %c0_i32_1 = arith.constant 0 : i32
    return %arg0, %c0_i32, %c0_i32_0 : i32, i32, i32
  }
  func.func @transform_5(%arg0: i32, %arg1: i32) -> (i32, i32, i32) {
    %c0_i32 = arith.constant 0 : i32
    %c0_i32_0 = arith.constant 0 : i32
    %c0_i32_1 = arith.constant 0 : i32
    return %arg0, %c0_i32, %c0_i32_0 : i32, i32, i32
  }
  func.func @transform_6(%arg0: i32, %arg1: i32) -> (i32, i32, i32) {
    %c0_i32 = arith.constant 0 : i32
    %c0_i32_0 = arith.constant 0 : i32
    return %arg0, %arg1, %c0_i32 : i32, i32, i32
  }
  func.func @transform_7(%arg0: i32, %arg1: i32) -> (i32, i32, i32) {
    %c0_i32 = arith.constant 0 : i32
    %c0_i32_0 = arith.constant 0 : i32
    %c0_i32_1 = arith.constant 0 : i32
    return %arg0, %c0_i32, %c0_i32_0 : i32, i32, i32
  }
}

</mosaic_0001>

<bundles_post_ra>
// kernel: tpu_custom_call.1
= control target key start
LH: loop header
LB: loop body
LE: loop exit
PB: predicated region body
PF: predicated region fallthrough
CT: control target
= control target key end

     0   :  { %s2086_s0 = inlined_call_operand.hbm [shape: bf16[4,8,8], index: 0, kind: input, shape index: {}]   ;;  %s2087_s1 = inlined_call_operand.hbm [shape: bf16[4,8,8], index: 1, kind: input, shape index: {}]   ;;  %s2088_s2 = inlined_call_operand.hbm [shape: bf16[4,8,8], index: 2, kind: input, shape index: {}]   ;;  %s2089_s3 = inlined_call_operand.hbm [shape: bf16[4,8,8], index: 3, kind: input, shape index: {}]   ;;  %s2090_s4 = inlined_call_operand.hbm [shape: f32[4,1,8], index: 4, kind: input, shape index: {}]   ;;  %s2091_s5 = inlined_call_operand.hbm [shape: f32[4,8,8], index: 5, kind: input, shape index: {}]   ;;  %s2092_s6 = inlined_call_operand.hbm [shape: f32[4,8,8], index: 6, kind: output, shape index: {0}]   ;;  %s2093_s7 = inlined_call_operand.hbm [shape: f32[4,8,8], index: 7, kind: output, shape index: {1}]  }
   0x1   :  { %2101 = sst [smem:[#allocation28_spill]] %s2086_s0 }
   0x2   :  { %2102 = sst [smem:[#allocation29_spill]] %s2087_s1 }
   0x3   :  { %2103 = sst [smem:[#allocation30_spill]] %s2088_s2 }
   0x4   :  { %2104 = sst [smem:[#allocation31_spill]] %s2089_s3 }
   0x5   :  { %2105 = sst [smem:[#allocation32_spill]] %s2093_s7 }
   0x6   :  { %13 = vsyncpa [#allocation3], 0 }
   0x7   :  { %15 = vsyncpa [#allocation3 + $0x1], 0 }
   0x8   :  { %16 = vsyncpa [#allocation6], 0 }
   0x9   :  { %18 = vsyncpa [#allocation6 + $0x1], 0 }
   0xa   :  { %19 = vsyncpa [#allocation9], 0 }
   0xb   :  { %21 = vsyncpa [#allocation9 + $0x1], 0 }
   0xc   :  { %22 = vsyncpa [#allocation12], 0 }
   0xd   :  { %24 = vsyncpa [#allocation12 + $0x1], 0 }
   0xe   :  { %25 = vsyncpa [#allocation4], 0 }
   0xf   :  { %27 = vsyncpa [#allocation4 + $0x1], 0 }
  0x10   :  { %28 = vsyncpa [#allocation15], 0 }
  0x11   :  { %30 = vsyncpa [#allocation15 + $0x1], 0  ;;  %s1773_s24 = smov 0   ;;  %s1775_s25 = smov 0  }
  0x12   :  { %s1777_s26 = smov 0   ;;  %s1779_s27 = smov 0  }
  0x13   :  { %s1781_s28 = smov 0   ;;  %s1783_s29 = smov 0  }
  0x14 LB: > { %2106 = sst [smem:[#allocation22_spill]] %s1702_s24  ;;  %s1804_s30 = sadd.s32 4294967295, %s1722_s29   ;;  %s1722_s29 = sphi %s1783_s29, %s36_s29   ;;  %s1718_s28 = sphi %s1781_s28, %s2132_s28   ;;  %s1714_s27 = sphi %s1779_s27, %s2131_s27   ;;  %s1710_s26 = sphi %s1777_s26, %s2127_s26   ;;  %s1706_s25 = sphi %s1775_s25, %s2130_s25   ;;  %s1702_s24 = sphi %s1773_s24, %s2129_s24  }
  0x15   : > { %2107 = sst [smem:[#allocation23_spill]] %s1710_s26  ;;  %s1221_s8 = sadd.s32 4294967294, %s1722_s29  }
  0x16   : > { %2108 = sst [smem:[#allocation24_spill]] %s1722_s29  ;;  %s48_s9 = sadd.s32 1, %s1718_s28 }
  0x17   : > { %s57_s10 = sadd.s32 1, %s1710_s26  ;;  %p50_p0 = scmp.ge.s32.totalorder %s48_s9, 2 }
  0x18   : > { %p64_p1 = scmp.ne.s32.totalorder %s1710_s26, %s1706_s25  ;;  %p65_p2 = scmp.eq.s32.totalorder %s1722_s29, 0 }
  0x19   : > { %p70_p3 = scmp.ne.s32.totalorder %s1706_s25, %s1702_s24  ;;  %s2134_s9 = smov (%p50_p0, %s48_s9), 0 }
  0x1a   : > { %2109 = sst [smem:[#allocation25_spill]] %s2134_s9  ;;  %p1816_p4 = por %p65_p2, %p64_p1 }
  0x1b   : > { %p71_p5 = scmp.eq.s32.totalorder %s1804_s30, 0  ;;  %s52_s12 = ssub.s32 %s1718_s28, %s2134_s9 }
  0x1c   : > { %p232_p6 = scmp.eq.s32.totalorder %s1804_s30, 1  ;;  %p55_p7 = scmp.eq.s32.totalorder %s52_s12, 0 }
  0x1d   : > { %p1824_p8 = por %p71_p5, %p70_p3  ;;  %p238_p10 = scmp.eq.s32.totalorder %s1221_s8, 1 }
  0x1e   : > { %p1828_p9 = por %p232_p6, %p64_p1  ;;  %p1223_p12 = scmp.ge.s32.totalorder %s1722_s29, 2 }
  0x1f   : > { %s1833_s15 = scalar_select %p55_p7, %s1710_s26, %s57_s10  }
  0x20   : > { %p1835_p11 = por %p238_p10, %p70_p3  ;;  %p1337_p13 = scmp.lt.s32.totalorder %s1722_s29, 2 }
  0x21   : > { %2113 = sst [smem:[#allocation26_spill]] %s1833_s15  ;;  %s1842_s17 = sand.u32 1, %s1710_s26  }
  0x22   : > { %s2114_s16 = scalar_select %p1835_p11, 1, 0 }
  0x23   : > { %s1845_s18 = sshll.u32 %s1842_s17, 3  ;;  %s1848_s19 = sshll.u32 %s1718_s28, 3 }
  0x24   : > { %2115 = sst [smem:[#allocation27_spill]] %s2114_s16  ;;  %p1852_p0 = pnand %p1337_p13, %p1816_p4 }
  0x25   : > { %s307_s21 = sand.u32 1, %s1722_s29   ;;  %s2117_s1 = sld [smem:[#allocation29_spill]] }
  0x26   : > { %s311_s12 = scalar_lea.vmem [#allocation5], %s1845_s18  ;;  %s1862_s11 = scalar_lea.sflag [#allocation6], %s307_s21 }
  0x27   : > { %s320_s9 = sshll.u32 %s311_s12, 4  ;;  %s1724_s15 = smov 64   ;;  %s321_s9 = int_to_ptr.vmem [resolvable:$true] %s320_s9 }
  0x28   : > { %s1725_s26 = smov 4   ;;  %p1241_p1 = scmp.ge.s32.totalorder %s1722_s29, 1 }
  0x29   : > { %p417_p2 = scmp.lt.s32.totalorder %s1722_s29, 3  ;;  %s2119_s3 = sld [smem:[#allocation31_spill]] }
  0x2a   : > { %s357_s16 = scalar_lea.vmem [#allocation8], %s1845_s18  ;;  %s2120_s0 = sld [smem:[#allocation28_spill]] }
  0x2b   : > { %s317_s8 = scalar_lea.hbm %s2117_s1, %s1848_s19  ;;  %p1872_p3 = pnand %p1241_p1, %p417_p2 }
  0x2c   : > { %s318_s10 = sshll.u32 %s317_s8, 4  ;;  %s366_s24 = sshll.u32 %s357_s16, 4  ;;  %s319_s10 = int_to_ptr.hbm [resolvable:$true] %s318_s10  ;;  %s367_s24 = int_to_ptr.vmem [resolvable:$true] %s366_s24 }
  0x2d   : > { %1317 = dma.hbm_to_vmem [thread:$0]  (!%p1852_p0), %s319_s10, 128, %s321_s9, %s1862_s11, %s1724_s15, %s1724_s15, %s1725_s26  }
  0x2e   : > { %s1881_s9 = scalar_lea.sflag [#allocation9], %s307_s21  ;;  %s285_s21 = scalar_lea.sflag [#allocation3], %s1842_s17 }
  0x2f   : > { %s363_s12 = scalar_lea.hbm %s2119_s3, %s1848_s19  ;;  %s2121_s2 = sld [smem:[#allocation30_spill]] }
  0x30   : > { %s364_s1 = sshll.u32 %s363_s12, 4  ;;  %s294_s8 = scalar_lea.hbm %s2120_s0, %s1848_s19  ;;  %s365_s1 = int_to_ptr.hbm [resolvable:$true] %s364_s1 }
  0x31   : > { %1323 = dma.hbm_to_vmem [thread:$0]  (!%p1852_p0), %s365_s1, 128, %s367_s24, %s1881_s9, %s1724_s15, %s1724_s15, %s1725_s26  }
  0x32   : > { %s288_s12 = scalar_lea.vmem [#allocation2], %s1845_s18  ;;  %s295_s3 = sshll.u32 %s294_s8, 4  ;;  %s296_s3 = int_to_ptr.hbm [resolvable:$true] %s295_s3 }
  0x33   : > { %s297_s16 = sshll.u32 %s288_s12, 4  ;;  %s334_s10 = scalar_lea.vmem [#allocation7], %s1845_s18  ;;  %s298_s16 = int_to_ptr.vmem [resolvable:$true] %s297_s16 }
  0x34   : > { %1314 = dma.hbm_to_vmem [thread:$0]  (!%p1852_p0), %s296_s3, 128, %s298_s16, %s285_s21, %s1724_s15, %s1724_s15, %s1725_s26  }
  0x35   : > { %s340_s24 = scalar_lea.hbm %s2121_s2, %s1848_s19  ;;  %s343_s23 = sshll.u32 %s334_s10, 4  ;;  %s344_s23 = int_to_ptr.vmem [resolvable:$true] %s343_s23 }
  0x36   : > { %s341_s0 = sshll.u32 %s340_s24, 4  ;;  %s1236_s8 = sshll.u32 %s1842_s17, 1  ;;  %s342_s0 = int_to_ptr.hbm [resolvable:$true] %s341_s0 }
  0x37   : > { %1320 = dma.hbm_to_vmem [thread:$0]  (!%p1852_p0), %s342_s0, 128, %s344_s23, %s1862_s11, %s1724_s15, %s1724_s15, %s1725_s26  }
  0x38   : > { %s1237_s3 = sshll.u32 %s1718_s28, 1  ;;  %s380_s18 = scalar_lea.vmem [#allocation10], %s1236_s8 }
  0x39   : > { %s384_s29 = scalar_lea.hbm %s2090_s4, %s1237_s3  ;;  %s387_s19 = sshll.u32 %s380_s18, 4  ;;  %s388_s19 = int_to_ptr.vmem [resolvable:$true] %s387_s19 }
  0x3a   : > { %s385_s21 = sshll.u32 %s384_s29, 4  ;;  %s1726_s1 = smov 16   ;;  %s386_s21 = int_to_ptr.hbm [resolvable:$true] %s385_s21 }
  0x3b   : > { %s1727_s24 = smov 1   ;;  %s1238_s10 = sshll.u32 %s1842_s17, 4 }
  0x3c   : > { %1326 = dma.hbm_to_vmem [thread:$0]  (!%p1852_p0), %s386_s21, 32, %s388_s19, %s1881_s9, %s1726_s1, %s1726_s1, %s1727_s24  }
  0x3d   : > { %s1276_s2 = sshll.u32 %s1718_s28, 4  ;;  %s401_s11 = scalar_lea.vmem [#allocation11], %s1238_s10 }
  0x3e   : > { %s406_s26 = scalar_lea.hbm %s2091_s5, %s1276_s2  ;;  %s409_s23 = sshll.u32 %s401_s11, 4  ;;  %s410_s23 = int_to_ptr.vmem [resolvable:$true] %s409_s23 }
  0x3f   : > { %s407_s15 = sshll.u32 %s406_s26, 4  ;;  %s398_s8 = scalar_lea.sflag [#allocation12], %s1842_s17  ;;  %s408_s15 = int_to_ptr.hbm [resolvable:$true] %s407_s15 }
  0x40   : > { %s1728_s3 = smov 128   ;;  %s1729_s12 = smov 8  }
  0x41   : > { %1329 = dma.hbm_to_vmem [thread:$0]  (!%p1852_p0), %s408_s15, 256, %s410_s23, %s398_s8, %s1728_s3, %s1728_s3, %s1729_s12  }
  0x42   : > { %421 = sbr.rel (%p1872_p3) target bundleno = 543 (0x21f), region = 44  ;;  %s1930_s9 = sand.u32 (!%p1872_p3), 1, %s1706_s25  }
  0x43   : > { %s1933_s2 = sshll.u32 (!%p1872_p3), %s1930_s9, 3  ;;  %s424_s7 = scalar_lea.sflag (!%p1872_p3), [#allocation3], %s1930_s9 }
  0x44   : > { %s427_s16 = scalar_lea.vmem (!%p1872_p3), [#allocation2], %s1933_s2 }
  0x47   : > { %1677 = dma.done.wait (%p1824_p8), %s424_s7, 128  }
  0x48   : > { %1679 = vsyncadd (%p1824_p8), %s424_s7, 4294967168  ;;  %s433_s17 = sand.u32 1, %s1804_s30   ;;  %s437_s22 = scalar_lea.vmem [#allocation5], %s1933_s2 }
  0x49   : > { %s434_s20 = scalar_lea.sflag [#allocation6], %s433_s17 }
  0x4a   : > { %1681 = dma.done.wait (%p1824_p8), %s434_s20, 256  }
  0x4b   : > { %1683 = vsyncadd (%p1824_p8), %s434_s20, 4294967040  ;;  %s447_s29 = scalar_lea.vmem [#allocation7], %s1933_s2  ;;  %s454_s18 = scalar_lea.sflag [#allocation9], %s433_s17 }
  0x4c   : > { %s457_s19 = scalar_lea.vmem [#allocation8], %s1933_s2 }
  0x4d   : > { %1685 = dma.done.wait (%p1824_p8), %s454_s18, 160  }
  0x4e   : > { %1687 = vsyncadd (%p1824_p8), %s454_s18, 4294967136  ;;  %s1246_s30 = sshll.u32 %s1930_s9, 1  ;;  %s1955_s21 = sshll.u32 %s1930_s9, 4 }
  0x4f   : > { %s1957_s1 = scalar_lea.vmem [#allocation10], %s1246_s30  ;;  %s474_s24 = scalar_lea.sflag [#allocation12], %s1930_s9 }
  0x50   : > { %s477_s10 = scalar_lea.vmem [#allocation11], %s1955_s21 }
  0x51   : > { %1689 = dma.done.wait (%p1824_p8), %s474_s24, 256  }
  0x52   : > { %1691 = vsyncadd (%p1824_p8), %s474_s24, 4294967040  ;;  %v558_v0 = vlaneseq  ;;  %v1292_v2 = vld [vmem:[%s457_s19] sm:$0xff]   ;;  %vm553_vm1 = vcmask 64512   ;;  %v1730_v11 = vmov 0.0   ;;  %s1976_s13 = scalar_lea.vmem [#allocation14], %s1955_s21  ;;  %v1280_v31 = vld [vmem:[%s427_s16] sm:$0xff]  }
  0x53   : > { %v1293_v3 = vunpack.c.l.bf16 %v1292_v2  ;;  %v1294_v4 = vunpack.c.h.bf16 %v1292_v2  ;;  %v551_v14 = vld [vmem:[%s477_s10] sm:$0xff]  ;;  %v552_v15 = vld [vmem:[%s477_s10 + $0x8] sm:$0xff]  ;;  %v1281_v37 = vunpack.c.l.bf16 %v1280_v31  ;;  %v1282_v38 = vunpack.c.h.bf16 %v1280_v31  ;;  %s1277_s0 = sshll.u32 %s1714_s27, 4  ;;  %s531_s23 = scalar_lea.vmem [#allocation13], %s1955_s21 }
  0x54   : > { %v1965_v1 = vshrl.u32 %v558_v0, 7  ;;  %v1968_v7 = vand.u32 127, %v558_v0  ;;  %554 = vst.msk [vmem:[%s1976_s13] sm:$0xff] %vm553_vm1, %v551_v14  ;;  %v1284_v28 = vld [vmem:[%s437_s22] sm:$0xff]   ;;  %v1398_v48 = vld [vmem:[%s1957_s1] ss:$0 sm:$0xff]  ;;  %s966_s11 = scalar_lea.hbm %s2092_s6, %s1277_s0 }
  0x55   : > { %v586_v5 = vmul.f32 1.442695, %v1293_v3  ;;  %v588_v6 = vmul.f32 1.442695, %v1294_v4  ;;  %555 = vst.msk [vmem:[%s1976_s13 + $0x8] sm:$0xff] %vm553_vm1, %v552_v15  ;;  %v1285_v30 = vunpack.c.l.bf16 %v1284_v28  ;;  %v1286_v35 = vunpack.c.h.bf16 %v1284_v28  ;;  %v1288_v49 = vld [vmem:[%s447_s29] sm:$0xff]  }
  0x56   : > { %1396 = vset.pattern.permute.xlu2 %v1965_v1  ;;  %vm562_vm0 = vcmp.le.s32.totalorder %v1968_v7, %v1965_v1  ;;  %v1289_v50 = vunpack.c.l.bf16 %v1288_v49  ;;  %v1290_v51 = vunpack.c.h.bf16 %v1288_v49  ;;  %v758_v52 = vmul.f32 %v1398_v48, %v1281_v37  ;;  %v1399_v55 = vld [vmem:[%s1957_s1 + $0x1] ss:$0 sm:$0xff]  ;;  %s967_s8 = sshll.u32 %s531_s23, 4  ;;  %s969_s3 = sshll.u32 %s966_s11, 4  ;;  %s968_s8 = int_to_ptr.vmem [resolvable:$true] %s967_s8  ;;  %s970_s3 = int_to_ptr.hbm [resolvable:$true] %s969_s3 }
  0x57   : > { %1400 = vpow2.f32 %v586_v5  ;;  %v1250_v12 = vsel %vm562_vm0, 1.0, %v1730_v11  ;;  %v759_v56 = vmul.f32 %v1399_v55, %v1282_v38  ;;  %vm565_vm2 = vcmp.lt.s32.totalorder %v1968_v7, %v1965_v1  ;;  %s949_s12 = scalar_lea.sflag [#allocation4], %s1930_s9  ;;  %s1610_s2 = sshra.s32 %s970_s3, 4  ;;  %s1611_s2 = int_to_ptr.hbm [resolvable:$true] %s1610_s2 }
  0x58   : > { %1402 = vpow2.f32 %v588_v6  ;;  %v760_v53 = vmul.f32 %v1285_v30, %v758_v52  ;;  %v1251_v59 = vsel %vm565_vm2, 1.0, %v1730_v11  ;;  %s1612_s7 = scalar_lea.hbm %s1611_s2, 16  ;;  %s1616_s20 = scalar_lea.hbm %s2092_s6, 32 }
  0x59   : > { %v761_v57 = vmul.f32 %v1286_v35, %v759_v56  ;;  %p1613_p4 = scmp.ne.s32.totalorder %s1611_s2, %s1612_s7  ;;  %p1617_p7 = scmp.lt.s32.totalorder %s1611_s2, %s2092_s6 }
  0x5a   : > { %v762_v54 = vsel %vm553_vm1, %v760_v53, 0.0  ;;  %p1618_p8 = scmp.lt.s32.totalorder %s1616_s20, %s1612_s7 }
  0x5b   : > { %v1987_v41 = vld [vmem:[%s1976_s13] sm:$0xff]  ;;  %763 = vadd.xlane.f32.xlu1 %v762_v54  ;;  %v765_v58 = vsel %vm553_vm1, %v761_v57, 0.0  ;;  %p1614_p5 = pnand %p1613_p4, %p1828_p9 }
  0x5c   : > { %v1991_v44 = vld [vmem:[%s1976_s13 + $0x8] sm:$0xff]  ;;  %p1619_p10 = por %p1618_p8, %p1617_p7 }
  0x5d   : > { %v1401_v8 = vpop.eup %1400  ;;  %p1615_p6 = pneg %p1614_p5 }
  0x5e   : > { %v1403_v9 = vpop.eup %1402  ;;  %v590_v10 = vsub.f32 0.0, %v1401_v8 }
  0x5f   : > { %v591_v13 = vsub.f32 0.0, %v1403_v9  ;;  %p1620_p13 = pnand %p1619_p10, %p1615_p6 }
  0x60   : > { %611 = vmatpush.msra.mxu0 %v590_v10 }
  0x61   : > { %631 = vmatpush.msra.mxu1 %v591_v13  ;;  %1252 = vmatmul.msk.f32.vlgmr.msra.gmra.mxu0 %vm553_vm1, %v1250_v12 }
  0x62   : > { %1253 = vmatmul.msk.f32.vlgmr.msra.gmra.mxu1 %vm553_vm1, %v1250_v12  ;;  %724 = vmatpush.msrb.mxu0 %v1289_v50 }
  0x63   : > { %747 = vmatpush.msrb.mxu1 %v1290_v51  ;;  %766 = vadd.xlane.f32.xlu1 %v765_v58 }
  0x64   : > { %864 = vmatpush.msra.mxu0 %v1289_v50 }
  0x65   : > { %919 = vmatpush.msra.mxu1 %v1290_v51 }
  0xce   : > { %v764_v3 = vpop.xlane.xlu1 %763 }
  0xcf   : > { %v808_v4 = vmul.f32 %v1289_v50, %v764_v3 }
  0xde   : > { %v613_v16 = vpop.f32.mrf.mxu0 }
  0xdf   : > { %v636_v17 = vsub.f32 %v613_v16, %v590_v10  ;;  %v644_v18 = vsub.f32 0.0, %v613_v16  ;;  %v924_v19 = vmul.f32 1.442695, %v613_v16  ;;  %v633_v20 = vpop.f32.mrf.mxu1 }
  0xe0   : > { %v637_v21 = vsub.f32 %v633_v20, %v591_v13  ;;  %v645_v22 = vsub.f32 0.0, %v633_v20  ;;  %v926_v23 = vmul.f32 1.442695, %v633_v20 }
  0xe1   : > { %v638_v24 = vmul.f32 1.442695, %v636_v17  ;;  %v646_v25 = vmul.f32 1.442695, %v644_v18  ;;  %1404 = vpow2.f32 %v924_v19 }
  0xe2   : > { %v640_v26 = vmul.f32 1.442695, %v637_v21  ;;  %v648_v27 = vmul.f32 1.442695, %v645_v22  ;;  %1406 = vpow2.f32 %v926_v23 }
  0xe3   : > { %1408 = vpow2.f32 %v638_v24 }
  0xe4   : > { %1410 = vpow2.f32 %v646_v25 }
  0xe5   : > { %1412 = vpow2.f32 %v640_v26 }
  0xe6   : > { %1414 = vpow2.f32 %v648_v27 }
  0xe7   : > { %v1405_v29 = vpop.eup %1404 }
  0xe8   : > { %v1407_v32 = vpop.eup %1406  ;;  %v928_v33 = vperm.slane %v1405_v29, 7 }
  0xe9   : > { %v1409_v34 = vpop.eup %1408  ;;  %v935_v47 = vperm.slane %v1407_v32, 7 }
  0xea   : > { %v1411_v36 = vpop.eup %1410  ;;  %933 = vperm.xlu2 %1396, %v928_v33   ;;  %v642_v45 = vmul.f32 %v1409_v34, %v1281_v37 }
  0xeb   : > { %v1413_v39 = vpop.eup %1412  ;;  %v650_v40 = vmul.f32 %v1411_v36, %v1285_v30 }
  0xec   : > { %v1415_v42 = vpop.eup %1414  ;;  %v643_v46 = vmul.f32 %v1413_v39, %v1282_v38 }
  0xed   : > { %v651_v43 = vmul.f32 %v1415_v42, %v1286_v35  ;;  %814 = vxpose.xlu0.b32.start.end [1/1] (short) (narrow) %v650_v40, 8  ;;  %1254 = vmatpush.xpose.msk.msra.mxu2 %vm553_vm1, %v650_v40 }
  0xef   : > { %1256 = vmatpush.xpose.msk.msra.mxu3 %vm553_vm1, %v651_v43 }
  0xf0   : > { %1255 = vmatmul.msk.f32.vlgmr.msra.gmra.mxu2 %vm553_vm1, %v642_v45 }
  0xf1   : > { %783 = vmatpush.msrb.mxu2 %v1987_v41 }
  0xf2   : > { %1257 = vmatmul.msk.f32.vlgmr.msra.gmra.mxu3 %vm553_vm1, %v643_v46  ;;  %940 = vperm.xlu2 %1396, %v935_v47  }
  0xf3   : > { %803 = vmatpush.msrb.mxu3 %v1991_v44 }
  0xf5   : > { %869 = vxpose.xlu0.b32.start.end [1/1] (short) (narrow) %v651_v43, 8 }
  0xf8   : > { %1260 = vmatmul.msk.f32.vlgmr.msrb.gmra.mxu2 %vm553_vm1, %v642_v45 }
  0xfa   : > { %1261 = vmatmul.msk.f32.vlgmr.msrb.gmra.mxu3 %vm553_vm1, %v643_v46 }
 0x15c   : > { %1397 = vset.pattern.permute.xlu0 %v1965_v1  ;;  %v767_v1 = vpop.xlane.xlu1 %766 }
 0x15d   : > { %v809_v8 = vmul.f32 %v1290_v51, %v767_v1 }
 0x173   : > { %v675_v60 = vpop.f32.mrf.mxu2 }
 0x174   : > { %v704_v61 = vmul.f32 %v1251_v59, %v675_v60 }
 0x175   : > { %v701_v62 = vpop.f32.mrf.mxu3 }
 0x176   : > { %v705_v63 = vmul.f32 %v1251_v59, %v701_v62  ;;  %1258 = vmatmul.msk.f32.vlgmr.msrb.gmra.mxu0 %vm553_vm1, %v704_v61 }
 0x178   : > { %1259 = vmatmul.msk.f32.vlgmr.msrb.gmra.mxu1 %vm553_vm1, %v705_v63 }
 0x17b   : > { %v785_v5 = vpop.f32.mrf.mxu2 }
 0x17d   : > { %v805_v9 = vpop.f32.mrf.mxu3 }
 0x191   : > { %v830_v0 = vpop.trf.xlu0 }
 0x192   : > { %1262 = vmatmul.msk.f32.vlgmr.msra.gmra.mxu0 %vm553_vm1, %v830_v0 }
 0x199   : > { %v885_v2 = vpop.trf.xlu0 }
 0x19a   : > { %1263 = vmatmul.msk.f32.vlgmr.msra.gmra.mxu1 %vm553_vm1, %v885_v2 }
 0x1f3   : > { %v726_v6 = vpop.f32.mrf.mxu0 }
 0x1f4   : > { %v786_v7 = vadd.f32 %v785_v5, %v726_v6 }
 0x1f5   : > { %v749_v10 = vpop.f32.mrf.mxu1 }
 0x1f6   : > { %v810_v11 = vadd.f32 %v808_v4, %v786_v7  ;;  %v806_v12 = vadd.f32 %v805_v9, %v749_v10 }
 0x1f8   : > { %812 = vst.msk [vmem:[%s531_s23] sm:$0xff] %vm553_vm1, %v810_v11  ;;  %v811_v13 = vadd.f32 %v809_v8, %v806_v12 }
 0x1fa   : > { %813 = vst.msk [vmem:[%s531_s23 + $0x8] sm:$0xff] %vm553_vm1, %v811_v13 }
 0x1fb   : > { %1623 = shalt.err (!%p1620_p13)
}
 0x1fc   : > { %s1731_s18 = smov 128   ;;  %s1732_s19 = smov 8   ;;  %v934_v14 = vpop.permute.xlu2 %933 }
 0x1fd   : > { %1307 = dma.vmem_to_hbm [thread:$0]  (%p1828_p9), %s968_s8, 256, %s970_s3, %s949_s12, %s1731_s18, %s1731_s18, %s1732_s19  }
 0x1fe   : > { %s2122_s1 = sld [smem:[#allocation32_spill]]  ;;  %s984_s10 = sshll.u32 %s1976_s13, 4  ;;  %s985_s10 = int_to_ptr.vmem [resolvable:$true] %s984_s10 }
 0x1ff   : > { %s954_s15 = scalar_lea.sflag [#allocation15], %s1930_s9 }
 0x204   : > { %s983_s24 = scalar_lea.hbm %s2122_s1, %s1277_s0  ;;  %v941_v20 = vpop.permute.xlu2 %940  ;;  %s1644_s8 = scalar_lea.hbm %s2122_s1, 32 }
 0x205   : > { %s986_s26 = sshll.u32 %s983_s24, 4  ;;  %s987_s26 = int_to_ptr.hbm [resolvable:$true] %s986_s26 }
 0x206   : > { %s1638_s11 = sshra.s32 %s987_s26, 4  ;;  %s1639_s11 = int_to_ptr.hbm [resolvable:$true] %s1638_s11 }
 0x207   : > { %s1640_s27 = scalar_lea.hbm %s1639_s11, 16  ;;  %p1645_p3 = scmp.lt.s32.totalorder %s1639_s11, %s2122_s1 }
 0x208   : > { %p1641_p0 = scmp.ne.s32.totalorder %s1639_s11, %s1640_s27  ;;  %p1646_p4 = scmp.lt.s32.totalorder %s1644_s8, %s1640_s27 }
 0x20a   : > { %p1642_p1 = pnand %p1641_p0, %p1828_p9  ;;  %p1647_p5 = por %p1646_p4, %p1645_p3 }
 0x20c   : > { %p1643_p2 = pneg %p1642_p1 }
 0x20e   : > { %p1648_p6 = pnand %p1647_p5, %p1643_p2 }
 0x20f   : > { %v866_v15 = vpop.f32.mrf.mxu0 }
 0x210   : > { %v942_v16 = vadd.f32 %v866_v15, %v1987_v41 }
 0x212   : > { %v944_v17 = vmul.f32 %v942_v16, %v934_v14 }
 0x214   : > { %946 = vst.msk [vmem:[%s1976_s13] sm:$0xff] %vm553_vm1, %v944_v17 }
 0x217   : > { %v921_v18 = vpop.f32.mrf.mxu1 }
 0x218   : > { %v943_v19 = vadd.f32 %v921_v18, %v1991_v44 }
 0x21a   : > { %v945_v21 = vmul.f32 %v943_v19, %v941_v20 }
 0x21c   : > { %947 = vst.msk [vmem:[%s1976_s13 + $0x8] sm:$0xff] %vm553_vm1, %v945_v21 }
 0x21d   : > { %1651 = shalt.err (!%p1648_p6)
}
 0x21e   : > { %1308 = dma.vmem_to_hbm [thread:$0]  (%p1828_p9), %s985_s10, 256, %s987_s26, %s954_s15, %s1731_s18, %s1731_s18, %s1732_s19  }
 0x21f PF: > { %s2123_s9 = sld [smem:[#allocation22_spill]]  ;;  %p1331_p7 = pnand %p1223_p12, %p1835_p11 }
 0x220   : > { %s2125_s2 = sld [smem:[#allocation24_spill]] }
 0x221   : > { %p1332_p8 = pneg %p1331_p7 }
 0x225   : > { %s1001_s7 = sand.u32 1, %s2123_s9  }
 0x226   : > { %s1002_s16 = scalar_lea.sflag [#allocation4], %s1001_s7 }
 0x227   : > { %1693 = dma.done.wait (%p1332_p8), %s1002_s16, 256  }
 0x228   : > { %1695 = vsyncadd (%p1332_p8), %s1002_s16, 4294967040  ;;  %s1012_s17 = scalar_lea.sflag [#allocation15], %s1001_s7 }
 0x229   : > { %1697 = dma.done.wait (%p1332_p8), %s1012_s17, 256  }
 0x22a   : > { %1699 = vsyncadd (%p1332_p8), %s1012_s17, 4294967040  ;;  %s36_s29 = sadd.s32 1, %s2125_s2   ;;  %s2126_s14 = sld [smem:[#allocation23_spill]] }
 0x22b   : > { %p33_p10 = scmp.ge.s32.totalorder %s36_s29, 4   ;;  %s2127_s26 = sld [smem:[#allocation26_spill]] }
 0x22c   : > { %s2128_s20 = sld [smem:[#allocation25_spill]]  ;;  %s2129_s24 = smov %s1706_s25 }
 0x22d   : > { %s2131_s27 = smov %s1718_s28 }
 0x22e   :  { %35 = sbr.rel (!%p33_p10) target bundleno = 20 (0x14), region = 171 }
 0x230   : > { %s2130_s25 = smov %s2126_s14 }
 0x232   : > { %s2132_s28 = smov %s2128_s20 }
 0x233   :  { %1018 = vsyncpa [#allocation3], 1 }
 0x234   :  { %1020 = vsyncpa [#allocation3 + $0x1], 1 }
 0x235   :  { %1021 = vsyncpa [#allocation6], 1 }
 0x236   :  { %1023 = vsyncpa [#allocation6 + $0x1], 1 }
 0x237   :  { %1024 = vsyncpa [#allocation9], 1 }
 0x238   :  { %1026 = vsyncpa [#allocation9 + $0x1], 1 }
 0x239   :  { %1027 = vsyncpa [#allocation12], 1 }
 0x23a   :  { %1029 = vsyncpa [#allocation12 + $0x1], 1 }
 0x23b   :  { %1030 = vsyncpa [#allocation4], 1 }
 0x23c   :  { %1032 = vsyncpa [#allocation4 + $0x1], 1 }
 0x23d   :  { %1033 = vsyncpa [#allocation15], 1 }
 0x23e   :  { %1035 = vsyncpa [#allocation15 + $0x1], 1 }

</bundles_post_ra>
